<compile_context>
chip_gen: v7x
topology: tpu7x:2x2x1
jax: 0.10.0
libtpu: 0.0.40
codegen_flags: <defaults>
</compile_context>

<pallas_src>
import jax
import jax.numpy as jnp
from jax.experimental import pallas as pl
from jax.experimental.pallas import tpu as pltpu


# --------------------------------------------------------------------------- kernel
def simplenet_kernel(x_ref, w_in_ref, w_mid_ref, w_out_ref, b_hid_ref, b_out_ref, o_ref):
    """Whole MLP forward for one batch tile, feature-major / lane-dense layout.

    x_ref:     (input_size, TB)      -- batch on the 128-lane axis
    w_in_ref:  (H, input_size)       -- pre-transposed
    w_mid_ref: (3, H, H)             -- l1, l2, l3 weights, BN of previous layer folded
    w_out_ref: (output_size, H)      -- BN3 folded in, pre-transposed
    b_hid_ref: (H, 4)                -- biases of input, l1, l2, l3 as columns (f32)
    b_out_ref: (output_size, 1)      -- f32
    o_ref:     (output_size, TB)     -- lane-dense output slab
    """
    wdt = w_in_ref.dtype            # bf16 by default (MXU-native); f32 accumulation

    b_hid = b_hid_ref[...]          # (H, 4), loaded once
    h = x_ref[...]                  # (input_size, TB) f32

    # input -> hidden, ReLU   (BN0 is folded into w_mid[0] / b_hid[:,1])
    h = jnp.maximum(
        jnp.dot(w_in_ref[...], h.astype(wdt), preferred_element_type=jnp.float32)
        + b_hid[:, 0:1],
        0.0,
    )

    # l1, l2, l3: dot + bias + ReLU (static unroll; w_mid_ref[i] is a static slice)
    for i in range(3):
        h = jnp.maximum(
            jnp.dot(w_mid_ref[i], h.astype(wdt), preferred_element_type=jnp.float32)
            + b_hid[:, i + 1:i + 2],
            0.0,
        )

    # output head (no activation, no BN)
    o_ref[...] = (
        jnp.dot(w_out_ref[...], h.astype(wdt), preferred_element_type=jnp.float32)
        + b_out_ref[...]
    ).astype(o_ref.dtype)


# ------------------------------------------------------------------------- wrappers
def _gridded_call(args, out_shape_t, batch_tile, *, buffered_1):
    """Batch-gridded pallas_call: x/o tiled along the lane (batch) axis, weights and
    biases full-block resident.  'parallel' lets v7x shard tiles across its two
    TensorCores; per-step x/o DMA overlaps compute via BlockSpec pipelining."""
    x_t, w_in, w_mid, w_out, b_hid, b_out = args
    input_size = x_t.shape[0]
    output_size, B = out_shape_t.shape

    def resident(shape):
        # Constant-index block: never re-DMA'd; single-buffer it when supported.
        kwargs = dict(pipeline_mode=pl.Buffered(1)) if buffered_1 else {}
        return pl.BlockSpec(shape, lambda *_i: (0,) * len(shape), **kwargs)

    in_specs = [
        pl.BlockSpec((input_size, batch_tile), lambda i: (0, i)),
        resident(w_in.shape),
        resident(w_mid.shape),
        resident(w_out.shape),
        resident(b_hid.shape),
        resident(b_out.shape),
    ]
    out_specs = pl.BlockSpec((output_size, batch_tile), lambda i: (0, i))
    return pl.pallas_call(
        simplenet_kernel,
        out_shape=out_shape_t,
        grid=(B // batch_tile,),
        in_specs=in_specs,
        out_specs=out_specs,
        # TODO(synk): for batch tiles in the >~100k-row range on v5e also raise
        # vmem_limit_bytes (scoped default 16 MiB there); irrelevant at this size.
        compiler_params=pltpu.CompilerParams(dimension_semantics=("parallel",)),
    )(*args)


def simplenet_forward(x, packed, *, batch_tile=512, grid_min_batch=16384):
    """x: (B, input_size) f32 -> (B, output_size) f32.  `packed`: fold_and_pack().

    Layout: batch is moved to the 128-lane axis (x.T / out.T are XLA-level layout
    plumbing outside the kernel), so all VPU work and the output store are lane-dense
    even though H=32 and output_size=12.

    Grid policy: single all-resident block for anything below `grid_min_batch`
    (the whole problem is tens of KB of VMEM); the gridded batch-parallel path is
    reserved for large B with >= 4 tiles so each v7x TensorCore gets >= 2 steps.
    """
    B, input_size = x.shape
    output_size = packed["w_out"].shape[0]

    x_t = x.T                                    # (input_size, B): batch on lanes
    args = (x_t, packed["w_in"], packed["w_mid"], packed["w_out"],
            packed["b_hid"], packed["b_out"])
    out_shape_t = jax.ShapeDtypeStruct((output_size, B), jnp.float32)

    use_grid = (
        B >= grid_min_batch
        and batch_tile % 128 == 0
        and B % batch_tile == 0
        and B // batch_tile >= 4      # >= 2 tiles per TC on v7x -> real pipelining
    )

    if use_grid:
        try:
            out_t = _gridded_call(args, out_shape_t, batch_tile, buffered_1=True)
            out_t = jax.block_until_ready(out_t)
        except Exception:
            # TODO(synk): pipeline_mode=pl.Buffered(1) needs a recent jax; retry the
            # same gridded kernel with default buffering (still correct).
            out_t = _gridded_call(args, out_shape_t, batch_tile, buffered_1=False)
        return out_t.T

    # Small/medium batches: one all-resident VMEM block, no grid (grid = overhead).
    vmem = pl.BlockSpec(memory_space=pltpu.MemorySpace.VMEM)
    out_t = pl.pallas_call(
        simplenet_kernel,
        out_shape=out_shape_t,
        in_specs=[vmem] * len(args),
        out_specs=vmem,
    )(*args)
    return out_t.T


# --------------------------------------------------------------- params & folding
def init_params(key, input_size, hidden_size, output_size):
    """Raw parameters (PyTorch semantics). Linear weights stored as (in, out)."""
    keys = jax.random.split(key, 26)
    it = iter(keys)

    def linear(fan_in, fan_out):
        bound = 1.0 / float(fan_in) ** 0.5
        w = jax.random.uniform(next(it), (fan_in, fan_out), jnp.float32, -bound, bound)
        b = jax.random.uniform(next(it), (fan_out,), jnp.float32, -bound, bound)
        return w, b

    def bn(n):
        # Non-trivial BN running stats so the host-side fold is actually exercised.
        gamma = jax.random.uniform(next(it), (n,), jnp.float32, 0.5, 1.5)
        beta = 0.1 * jax.random.normal(next(it), (n,), jnp.float32)
        mean = 0.1 * jax.random.normal(next(it), (n,), jnp.float32)
        var = jax.random.uniform(next(it), (n,), jnp.float32, 0.5, 1.5)
        return (gamma, beta, mean, var)

    w_in, b_in = linear(input_size, hidden_size)
    w1, b1 = linear(hidden_size, hidden_size)
    w2, b2 = linear(hidden_size, hidden_size)
    w3, b3 = linear(hidden_size, hidden_size)
    w_out, b_out = linear(hidden_size, output_size)

    return {
        "w_in": w_in, "b_in": b_in,
        "w1": w1, "b1": b1,
        "w2": w2, "b2": b2,
        "w3": w3, "b3": b3,
        "w_out": w_out, "b_out": b_out,
        "bn0": bn(hidden_size), "bn1": bn(hidden_size),
        "bn2": bn(hidden_size), "bn3": bn(hidden_size),
        "eps": 1e-5,
    }


def fold_and_pack(raw, *, dtype=jnp.bfloat16):
    """Fold each BatchNorm into the following Linear and pack transposed operands.

    Module order is Linear -> ReLU -> BN -> Dropout -> Linear, so BN_i (eval-mode
    affine y*s_i + t_i) folds into the *next* Linear's weight/bias.

    Weights are packed feature-major (pre-transposed, (out, in)) for the lane-dense
    (F, B) kernel layout.  `dtype` applies to the weight matrices only; bf16 (the
    default) is MXU-native, while accumulation stays f32 inside the kernel.  Biases
    stay f32.  Pass dtype=jnp.float32 for exact eval-mode numerics.
    """
    eps = raw["eps"]

    def scale_shift(gamma, beta, mean, var):
        s = gamma / jnp.sqrt(var + eps)
        return s, beta - mean * s

    s0, t0 = scale_shift(*raw["bn0"])
    s1, t1 = scale_shift(*raw["bn1"])
    s2, t2 = scale_shift(*raw["bn2"])
    s3, t3 = scale_shift(*raw["bn3"])

    w1 = s0[:, None] * raw["w1"];       b1 = raw["b1"] + t0 @ raw["w1"]
    w2 = s1[:, None] * raw["w2"];       b2 = raw["b2"] + t1 @ raw["w2"]
    w3 = s2[:, None] * raw["w3"];       b3 = raw["b3"] + t2 @ raw["w3"]
    w_out = s3[:, None] * raw["w_out"]; b_out = raw["b_out"] + t3 @ raw["w_out"]

    return {
        "w_in": raw["w_in"].T.astype(dtype),                   # (H, input_size)
        "w_mid": jnp.stack([w1.T, w2.T, w3.T]).astype(dtype),  # (3, H, H)
        "w_out": w_out.T.astype(dtype),                        # (output_size, H)
        # Biases as columns: broadcast over the lane (batch) axis inside the kernel.
        "b_hid": jnp.stack([raw["b_in"], b1, b2, b3], axis=1).astype(jnp.float32),  # (H, 4)
        "b_out": b_out[:, None].astype(jnp.float32),           # (output_size, 1)
    }


# ------------------------------------------------------------------- pure-JAX ref
def simplenet_reference(x, raw):
    """Un-fused eval-mode reference matching the PyTorch forward."""
    eps = raw["eps"]

    def bn(y, gamma, beta, mean, var):
        return (y - mean) / jnp.sqrt(var + eps) * gamma + beta

    h = jnp.maximum(x @ raw["w_in"] + raw["b_in"], 0.0)
    h = bn(h, *raw["bn0"])
    h = jnp.maximum(h @ raw["w1"] + raw["b1"], 0.0)
    h = bn(h, *raw["bn1"])
    h = jnp.maximum(h @ raw["w2"] + raw["b2"], 0.0)
    h = bn(h, *raw["bn2"])
    h = jnp.maximum(h @ raw["w3"] + raw["b3"], 0.0)
    h = bn(h, *raw["bn3"])
    return h @ raw["w_out"] + raw["b_out"]


# ------------------------------------------------------------------------- main
if __name__ == "__main__":
    # Module config: missing_list of length 1 -> input_size = 9 - 1 = 8; hidden=32; out=12.
    hidden_size = 32
    missing_list = [0]
    input_size = 9 - len(missing_list)
    output_size = 12

    key = jax.random.PRNGKey(0)
    k_x1, k_x2, k_x3, k_p = jax.random.split(key, 4)

    raw = init_params(k_p, input_size, hidden_size, output_size)
    packed_f32 = fold_and_pack(raw, dtype=jnp.float32)   # exact eval-mode numerics
    packed_bf16 = fold_and_pack(raw)                     # default: bf16 MXU weights

    def check(out, ref, tol):
        assert out.shape == ref.shape, (out.shape, ref.shape)
        err = float(jnp.max(jnp.abs(out - ref)))
        assert jnp.allclose(out, ref, atol=tol, rtol=tol), err

    # 1) Tiny batch (module-natural size): single all-resident block, no grid.
    x_small = jax.random.normal(k_x1, (8, input_size), dtype=jnp.float32)
    ref_small = simplenet_reference(x_small, raw)
    check(jax.block_until_ready(simplenet_forward(x_small, packed_f32)), ref_small, 1e-4)
    check(jax.block_until_ready(simplenet_forward(x_small, packed_bf16)), ref_small, 1e-1)

    # 2) Lane-dense single block (batch on the 128-lane axis; still no grid).
    x_med = jax.random.normal(k_x2, (512, input_size), dtype=jnp.float32)
    ref_med = simplenet_reference(x_med, raw)
    check(jax.block_until_ready(simplenet_forward(x_med, packed_f32)), ref_med, 1e-4)
    check(jax.block_until_ready(simplenet_forward(x_med, packed_bf16)), ref_med, 1e-1)

    # 3) Gridded batch-parallel path (8 tiles of 512 -> pipelined x/o DMA, megacore
    #    sharding on v7x); grid_min_batch lowered here just to exercise the path.
    x_big = jax.random.normal(k_x3, (4096, input_size), dtype=jnp.float32)
    ref_big = simplenet_reference(x_big, raw)
    out_big = jax.block_until_ready(
        simplenet_forward(x_big, packed_bf16, batch_tile=512, grid_min_batch=4096))
    check(out_big, ref_big, 1e-1)

    print("KERNEL_OK")
</pallas_src>

<mosaic_0001>
module attributes {stable_mosaic.version = 11 : i64} {
  func.func @simplenet_kernel(%arg0: memref<8x8xf32, #tpu.memory_space<vmem>>, %arg1: memref<32x8xf32, #tpu.memory_space<vmem>>, %arg2: memref<3x32x32xf32, #tpu.memory_space<vmem>>, %arg3: memref<12x32xf32, #tpu.memory_space<vmem>>, %arg4: memref<32x4xf32, #tpu.memory_space<vmem>>, %arg5: memref<12x1xf32, #tpu.memory_space<vmem>>, %arg6: memref<12x8xf32, #tpu.memory_space<vmem>>) attributes {dimension_semantics = [], scalar_prefetch = 0 : i64, scratch_operands = 0 : i64, tpu.core_type = #tpu.core_type<tc>} {
    %c0 = arith.constant 0 : index
    %c0_0 = arith.constant 0 : index
    %0 = vector.load %arg4[%c0, %c0_0] : memref<32x4xf32, #tpu.memory_space<vmem>>, vector<32x4xf32>
    %c0_1 = arith.constant 0 : index
    %c0_2 = arith.constant 0 : index
    %1 = vector.load %arg0[%c0_1, %c0_2] : memref<8x8xf32, #tpu.memory_space<vmem>>, vector<8x8xf32>
    %c0_3 = arith.constant 0 : index
    %c0_4 = arith.constant 0 : index
    %2 = vector.load %arg1[%c0_3, %c0_4] : memref<32x8xf32, #tpu.memory_space<vmem>>, vector<32x8xf32>
    %cst = arith.constant dense<0.000000e+00> : vector<32x8xf32>
    %3 = tpu.matmul %2, %1, %cst {dimension_numbers = #tpu.dot_dimension_numbers<[1], [0], [0], [1], [0, 0, 1, 1], [], []>} : vector<32x8xf32>, vector<8x8xf32>, vector<32x8xf32> -> vector<32x8xf32>
    %4 = vector.extract_strided_slice %0 {offsets = [0, 0], sizes = [32, 1], strides = [1, 1]} : vector<32x4xf32> to vector<32x1xf32>
    %5 = vector.broadcast %4 : vector<32x1xf32> to vector<32x8xf32>
    %6 = arith.addf %3, %5 : vector<32x8xf32>
    %cst_5 = arith.constant 0.000000e+00 : f32
    %7 = vector.broadcast %cst_5 : f32 to vector<32x8xf32>
    %8 = arith.maximumf %6, %7 : vector<32x8xf32>
    %c0_6 = arith.constant 0 : index
    %c0_7 = arith.constant 0 : index
    %c0_8 = arith.constant 0 : index
    %9 = vector.load %arg2[%c0_6, %c0_7, %c0_8] : memref<3x32x32xf32, #tpu.memory_space<vmem>>, vector<1x32x32xf32>
    %10 = vector.shape_cast %9 : vector<1x32x32xf32> to vector<32x32xf32>
    %cst_9 = arith.constant dense<0.000000e+00> : vector<32x8xf32>
    %11 = tpu.matmul %10, %8, %cst_9 {dimension_numbers = #tpu.dot_dimension_numbers<[1], [0], [0], [1], [0, 0, 1, 1], [], []>} : vector<32x32xf32>, vector<32x8xf32>, vector<32x8xf32> -> vector<32x8xf32>
    %12 = vector.extract_strided_slice %0 {offsets = [0, 1], sizes = [32, 1], strides = [1, 1]} : vector<32x4xf32> to vector<32x1xf32>
    %13 = vector.broadcast %12 : vector<32x1xf32> to vector<32x8xf32>
    %14 = arith.addf %11, %13 : vector<32x8xf32>
    %cst_10 = arith.constant 0.000000e+00 : f32
    %15 = vector.broadcast %cst_10 : f32 to vector<32x8xf32>
    %16 = arith.maximumf %14, %15 : vector<32x8xf32>
    %c1 = arith.constant 1 : index
    %c0_11 = arith.constant 0 : index
    %c0_12 = arith.constant 0 : index
    %17 = vector.load %arg2[%c1, %c0_11, %c0_12] : memref<3x32x32xf32, #tpu.memory_space<vmem>>, vector<1x32x32xf32>
    %18 = vector.shape_cast %17 : vector<1x32x32xf32> to vector<32x32xf32>
    %cst_13 = arith.constant dense<0.000000e+00> : vector<32x8xf32>
    %19 = tpu.matmul %18, %16, %cst_13 {dimension_numbers = #tpu.dot_dimension_numbers<[1], [0], [0], [1], [0, 0, 1, 1], [], []>} : vector<32x32xf32>, vector<32x8xf32>, vector<32x8xf32> -> vector<32x8xf32>
    %20 = vector.extract_strided_slice %0 {offsets = [0, 2], sizes = [32, 1], strides = [1, 1]} : vector<32x4xf32> to vector<32x1xf32>
    %21 = vector.broadcast %20 : vector<32x1xf32> to vector<32x8xf32>
    %22 = arith.addf %19, %21 : vector<32x8xf32>
    %cst_14 = arith.constant 0.000000e+00 : f32
    %23 = vector.broadcast %cst_14 : f32 to vector<32x8xf32>
    %24 = arith.maximumf %22, %23 : vector<32x8xf32>
    %c2 = arith.constant 2 : index
    %c0_15 = arith.constant 0 : index
    %c0_16 = arith.constant 0 : index
    %25 = vector.load %arg2[%c2, %c0_15, %c0_16] : memref<3x32x32xf32, #tpu.memory_space<vmem>>, vector<1x32x32xf32>
    %26 = vector.shape_cast %25 : vector<1x32x32xf32> to vector<32x32xf32>
    %cst_17 = arith.constant dense<0.000000e+00> : vector<32x8xf32>
    %27 = tpu.matmul %26, %24, %cst_17 {dimension_numbers = #tpu.dot_dimension_numbers<[1], [0], [0], [1], [0, 0, 1, 1], [], []>} : vector<32x32xf32>, vector<32x8xf32>, vector<32x8xf32> -> vector<32x8xf32>
    %28 = vector.extract_strided_slice %0 {offsets = [0, 3], sizes = [32, 1], strides = [1, 1]} : vector<32x4xf32> to vector<32x1xf32>
    %29 = vector.broadcast %28 : vector<32x1xf32> to vector<32x8xf32>
    %30 = arith.addf %27, %29 : vector<32x8xf32>
    %cst_18 = arith.constant 0.000000e+00 : f32
    %31 = vector.broadcast %cst_18 : f32 to vector<32x8xf32>
    %32 = arith.maximumf %30, %31 : vector<32x8xf32>
    %c0_19 = arith.constant 0 : index
    %c0_20 = arith.constant 0 : index
    %33 = vector.load %arg3[%c0_19, %c0_20] : memref<12x32xf32, #tpu.memory_space<vmem>>, vector<12x32xf32>
    %cst_21 = arith.constant dense<0.000000e+00> : vector<12x8xf32>
    %34 = tpu.matmul %33, %32, %cst_21 {dimension_numbers = #tpu.dot_dimension_numbers<[1], [0], [0], [1], [0, 0, 1, 1], [], []>} : vector<12x32xf32>, vector<32x8xf32>, vector<12x8xf32> -> vector<12x8xf32>
    %c0_22 = arith.constant 0 : index
    %c0_23 = arith.constant 0 : index
    %35 = vector.load %arg5[%c0_22, %c0_23] : memref<12x1xf32, #tpu.memory_space<vmem>>, vector<12x1xf32>
    %36 = vector.broadcast %35 : vector<12x1xf32> to vector<12x8xf32>
    %37 = arith.addf %34, %36 : vector<12x8xf32>
    %c0_24 = arith.constant 0 : index
    %c0_25 = arith.constant 0 : index
    %38 = vector.load %arg6[%c0_24, %c0_25] : memref<12x8xf32, #tpu.memory_space<vmem>>, vector<12x8xf32>
    tpu.vector_store %arg6[%c0_24, %c0_25], %37 {strides = array<i32>} : memref<12x8xf32, #tpu.memory_space<vmem>>, vector<12x8xf32>,
    return
  }
}

</mosaic_0001>

<bundles_post_ra>
// kernel: tpu_custom_call.1
= control target key start
LH: loop header
LB: loop body
LE: loop exit
PB: predicated region body
PF: predicated region fallthrough
CT: control target
= control target key end

     0   :  { %11 = vsyncpa [#allocation3], 0  ;;  %s1063_s0 = inlined_call_operand.hbm [shape: f32[8,8], index: 0, kind: input, shape index: {}]   ;;  %s1064_s1 = inlined_call_operand.vmem [shape: f32[32,8], index: 1, kind: input, shape index: {}]   ;;  %s1065_s2 = inlined_call_operand.vmem [shape: f32[3,32,32], index: 2, kind: input, shape index: {}]   ;;  %s1066_s3 = inlined_call_operand.hbm [shape: f32[12,32], index: 3, kind: input, shape index: {}]   ;;  %s1067_s4 = inlined_call_operand.vmem [shape: f32[32,4], index: 4, kind: input, shape index: {}]   ;;  %s1068_s5 = inlined_call_operand.vmem [shape: f32[12,1], index: 5, kind: input, shape index: {}]   ;;  %s1069_s6 = inlined_call_operand.vmem [shape: f32[12,8], index: 6, kind: output, shape index: {}]  }
   0x1   :  { %12 = vsyncpa [#allocation5], 0  ;;  %s870_s21 = smov [#allocation2]   ;;  %s871_s23 = smov [#allocation4]  }
   0x2   :  { %s19_s22 = sshll.u32 %s870_s21, 4  ;;  %s32_s24 = sshll.u32 %s871_s23, 4  ;;  %s20_s22 = int_to_ptr.vmem [resolvable:$true] %s19_s22  ;;  %s913_s24 = int_to_ptr.vmem [resolvable:$true] %s32_s24 }
   0x3   :  { %s822_s27 = scalar_lea.hbm %s1063_s0, 128 }
   0x4   :  { %p823_p0 = scmp.ne.s32.totalorder %s1063_s0, %s822_s27  ;;  %p826_p1 = scmp.lt.u32.totalorder %s822_s27, %s1063_s0 }
   0x6   :  { %p828_p2 = pnand %p826_p1, %p823_p0 }
   0x8   :  { %831 = shalt.err (!%p828_p2)
}
   0x9   :  { %s832_s8 = scalar_lea.vmem %s20_s22, 128  ;;  %p837_p4 = scmp.lt.s32.totalorder %s20_s22, %s20_s22 }
   0xa   :  { %p833_p3 = scmp.ne.s32.totalorder %s20_s22, %s832_s8  ;;  %p838_p5 = scmp.lt.s32.totalorder %s832_s8, %s832_s8 }
   0xc   :  { %p839_p6 = por %p838_p5, %p837_p4 }
   0xe   :  { %p840_p7 = pnand %p839_p6, %p833_p3 }
  0x10   :  { %843 = shalt.err (!%p840_p7)
}
  0x11   :  { %22 = dma.hbm_to_vmem [thread:$0]  %s1063_s0, 128, %s20_s22, [#allocation3]  }
  0x12   :  { %s844_s13 = scalar_lea.hbm %s1066_s3, 256 }
  0x13   :  { %p845_p8 = scmp.ne.s32.totalorder %s1066_s3, %s844_s13  ;;  %p848_p9 = scmp.lt.u32.totalorder %s844_s13, %s1066_s3 }
  0x15   :  { %p850_p10 = pnand %p848_p9, %p845_p8 }
  0x17   :  { %853 = shalt.err (!%p850_p10)
}
  0x18   :  { %s854_s18 = scalar_lea.vmem %s913_s24, 256  ;;  %p859_p12 = scmp.lt.s32.totalorder %s913_s24, %s913_s24 }
  0x19   :  { %p855_p11 = scmp.ne.s32.totalorder %s913_s24, %s854_s18  ;;  %p860_p13 = scmp.lt.s32.totalorder %s854_s18, %s854_s18 }
  0x1b   :  { %p861_p0 = por %p860_p13, %p859_p12 }
  0x1d   :  { %p862_p1 = pnand %p861_p0, %p855_p11 }
  0x1f   :  { %865 = shalt.err (!%p862_p1)
}
  0x20   :  { %s872_s0 = smov 128   ;;  %s873_s19 = smov 8  }
  0x21   :  { %38 = dma.hbm_to_vmem [thread:$0]  %s1066_s3, 256, %s913_s24, [#allocation5], %s872_s0, %s872_s0, %s873_s19  }
  0x22   :  { %866 = dma.done.wait [#allocation3], 128  }
  0x23   :  { %867 = vsyncadd [#allocation3], 4294967168 }
  0x24   :  { %868 = dma.done.wait [#allocation5], 256  }
  0x25   :  { %869 = vsyncadd [#allocation5], 4294967040  ;;  %v874_v0 = vmov 0   ;;  %vm78_vm0 = vcmask 64512   ;;  %v53_v1 = vld [vmem:[#allocation2] sm:$0xff]  ;;  %v55_v3 = vld [vmem:[%s1064_s1 + $0x8] sm:$0xff] }
  0x26   :  { %812 = vset.pattern.permute.xlu0 %v874_v0  ;;  %813 = vset.pattern.permute.xlu1 %v874_v0  ;;  %v54_v2 = vld [vmem:[%s1064_s1] sm:$0xff]  ;;  %v56_v4 = vld [vmem:[%s1064_s1 + $0x10] sm:$0xff]  ;;  %v972_v7 = vld [vmem:[%s1067_s4 + $0x8] sm:$0xff]  ;;  %vm200_vm1 = vcmask 261120   ;;  %v875_v11 = vmov 1   ;;  %v876_v34 = vmov 2  }
  0x27   :  { %711 = vmatprep.subr.mxu0 %v53_v1  ;;  %713 = vmatprep.mubr.msk.f32.mxu0 %vm78_vm0, %v54_v2  ;;  %v959_v5 = vld [vmem:[%s1067_s4] sm:$0xff]  ;;  %v965_v6 = vld [vmem:[%s1067_s4 + $0x10] sm:$0xff]  ;;  %v57_v8 = vld [vmem:[%s1064_s1 + $0x18] sm:$0xff]  ;;  %v877_v57 = vmov 3   ;;  %vm642_vm2 = vcmask 60416  }
  0x28   :  { %712 = vmatpush3.msra.mxu0 %v53_v1  ;;  %60 = vperm.xlu0 %812, %v959_v5   ;;  %v981_v9 = vld [vmem:[%s1067_s4 + $0x18] sm:$0xff]  ;;  %v180_v10 = vld [vmem:[%s1065_s2] sm:$0xff]  ;;  %v181_v30 = vld [vmem:[%s1065_s2 + $0x8] sm:$0xff] }
  0x29   :  { %714 = vmatmul.mubr.msk.f32.vlgmr.msra.gmra.mrb[0].mxu0 %vm78_vm0, %v55_v3  ;;  %70 = vperm.xlu1 %813, %v965_v6   ;;  %v182_v31 = vld [vmem:[%s1065_s2 + $0x10] sm:$0xff]  ;;  %v183_v32 = vld [vmem:[%s1065_s2 + $0x18] sm:$0xff]  ;;  %v658_v33 = vld [vmem:[%s1065_s2 + $0x20] sm:$0xff] }
  0x2a   :  { %716 = vmatprep.mubr.msk.f32.mxu0 %vm78_vm0, %v56_v4  ;;  %727 = vmatprep.mubr.msk.f32.mxu1 %vm200_vm1, %v180_v10  ;;  %v659_v53 = vld [vmem:[%s1065_s2 + $0x28] sm:$0xff]  ;;  %v660_v54 = vld [vmem:[%s1065_s2 + $0x30] sm:$0xff]  ;;  %v661_v55 = vld [vmem:[%s1065_s2 + $0x38] sm:$0xff] }
  0x2b   :  { %v666_v56 = vld [vmem:[%s1065_s2 + $0x40] sm:$0xff] }
  0x2c   :  { %65 = vperm.xlu0 %812, %v972_v7  }
  0x2d   :  { %717 = vmatmul.mubr.msk.f32.gmra.mrb[2].mxu0 %vm78_vm0, %v57_v8  ;;  %75 = vperm.xlu1 %813, %v981_v9  }
  0x2e   :  { %741 = vmatprep.mubr.msk.f32.mxu0 %vm200_vm1, %v658_v33 }
  0x30   :  { %814 = vset.pattern.permute.xlu0 %v875_v11 }
  0x31   :  { %815 = vset.pattern.permute.xlu1 %v875_v11  ;;  %185 = vperm.xlu0 %814, %v959_v5  }
  0x32   :  { %189 = vperm.xlu1 %815, %v972_v7  }
  0x35   :  { %197 = vperm.xlu0 %814, %v981_v9  }
  0x36   :  { %193 = vperm.xlu1 %815, %v965_v6  }
  0x39   :  { %817 = vset.pattern.permute.xlu0 %v876_v34 }
  0x3a   :  { %816 = vset.pattern.permute.xlu1 %v876_v34  ;;  %312 = vperm.xlu0 %817, %v972_v7  }
  0x3b   :  { %308 = vperm.xlu1 %816, %v959_v5  }
  0x3e   :  { %818 = vset.pattern.permute.xlu0 %v877_v57 }
  0x3f   :  { %316 = vperm.xlu1 %816, %v965_v6   ;;  %430 = vperm.xlu0 %818, %v959_v5  }
  0x43   :  { %320 = vperm.xlu1 %816, %v981_v9   ;;  %442 = vperm.xlu0 %818, %v981_v9  }
  0x47   :  { %819 = vset.pattern.permute.xlu1 %v877_v57  ;;  %821 = vset.pattern.permute.xlu0 %v874_v0 }
  0x48   :  { %434 = vperm.xlu1 %819, %v972_v7  }
  0x4c   :  { %438 = vperm.xlu1 %819, %v965_v6  }
  0x50   :  { %820 = vset.pattern.permute.xlu1 %v874_v0 }
  0xa7   :  { %v61_v12 = vpop.permute.xlu0 %60 }
  0xa8   :  { %v71_v13 = vpop.permute.xlu1 %70 }
  0xab   :  { %v66_v14 = vpop.permute.xlu0 %65 }
  0xac   :  { %v76_v21 = vpop.permute.xlu1 %75 }
  0xb0   :  { %v186_v35 = vpop.permute.xlu0 %185 }
  0xb1   :  { %v190_v36 = vpop.permute.xlu1 %189 }
  0xb4   :  { %v198_v43 = vpop.permute.xlu0 %197 }
  0xb5   :  { %v194_v45 = vpop.permute.xlu1 %193 }
  0xb9   :  { %v313_v60 = vpop.permute.xlu0 %312 }
  0xba   :  { %v309_v58 = vpop.permute.xlu1 %308 }
  0xbe   :  { %v317_v59 = vpop.permute.xlu1 %316 }
  0xc2   :  { %v321_v3 = vpop.permute.xlu1 %320 }
  0xfc   :  { %v715_v15 = vpop.f32.mrb[0].mxu0 }
  0xfd   :  { %v163_v16 = vadd.f32 %v715_v15, %v66_v14  ;;  %v157_v17 = vpop.f32.mrb[1].mxu0  ;;  %v669_v14 = vld [vmem:[%s1065_s2 + $0x58] sm:$0xff]  ;;  %v546_v15 = vld [vmem:[#allocation4] sm:$0xff] }
  0xfe   :  { %v158_v18 = vadd.f32 %v157_v17, %v61_v12  ;;  %v667_v12 = vld [vmem:[%s1065_s2 + $0x48] sm:$0xff] }
  0xff   :  { %v177_v19 = vmax.f32 %v163_v16, 0.0  ;;  %v548_v16 = vld [vmem:[%s1068_s5] sm:$0xff]  ;;  %v549_v17 = vld [vmem:[%s1068_s5 + $0x8] sm:$0xf] }
 0x100   :  { %v176_v20 = vmax.f32 %v158_v18, 0.0  ;;  %v718_v22 = vpop.f32.mrb[2].mxu0  ;;  %552 = vperm.xlu1 %820, %v548_v16   ;;  %557 = vperm.xlu0 %821, %v549_v17   ;;  %v431_v18 = vpop.permute.xlu0 %430 }
 0x101   :  { %v173_v23 = vadd.f32 %v718_v22, %v76_v21  ;;  %v167_v24 = vpop.f32.mrb[3].mxu0 }
 0x102   :  { %v168_v25 = vadd.f32 %v167_v24, %v71_v13  ;;  %v772_v26 = vpack.c.bf16 %v177_v19, %v176_v20  ;;  %v668_v13 = vld [vmem:[%s1065_s2 + $0x50] sm:$0xff]  ;;  %v435_v19 = vpop.permute.xlu1 %434 }
 0x103   :  { %v179_v27 = vmax.f32 %v173_v23, 0.0 }
 0x104   :  { %v178_v28 = vmax.f32 %v168_v25, 0.0  ;;  %773 = vmatprep.subr.bf16.mxu1 %v772_v26 }
 0x105   :  { %775 = vmatpush3.bf16.msra.mxu1 %v772_v26  ;;  %v443_v26 = vpop.permute.xlu0 %442 }
 0x106   :  { %v776_v29 = vpack.c.bf16 %v179_v27, %v178_v28  ;;  %v439_v28 = vpop.permute.xlu1 %438 }
 0x108   :  { %777 = vmatprep.subr.bf16.mxu1 %v776_v29 }
 0x109   :  { %779 = vmatpush3.bf16.msra.mxu1 %v776_v29 }
 0x10c   :  { %728 = vmatmul.mubr.msk.f32.vlgmr.msra.gmra.mrb[0].mxu1 %vm200_vm1, %v181_v30 }
 0x10d   :  { %730 = vmatprep.mubr.msk.f32.mxu1 %vm200_vm1, %v182_v31 }
 0x110   :  { %731 = vmatmul.mubr.msk.f32.gmra.mrb[2].mxu1 %vm200_vm1, %v183_v32 }
 0x111   :  { %755 = vmatprep.mubr.msk.f32.mxu1 %vm200_vm1, %v666_v56 }
 0x1df   :  { %v729_v37 = vpop.f32.mrb[0].mxu1 }
 0x1e0   :  { %v285_v38 = vadd.f32 %v729_v37, %v190_v36  ;;  %v279_v39 = vpop.f32.mrb[1].mxu1  ;;  %v547_v36 = vld [vmem:[#allocation4 + $0x8] sm:$0xf]  ;;  %v558_v37 = vpop.permute.xlu0 %557 }
 0x1e1   :  { %v280_v40 = vadd.f32 %v279_v39, %v186_v35 }
 0x1e2   :  { %v299_v41 = vmax.f32 %v285_v38, 0.0  ;;  %v553_v38 = vpop.permute.xlu1 %552 }
 0x1e3   :  { %v298_v42 = vmax.f32 %v280_v40, 0.0  ;;  %v732_v44 = vpop.f32.mrb[2].mxu1 }
 0x1e4   :  { %v295_v46 = vadd.f32 %v732_v44, %v198_v43  ;;  %v289_v47 = vpop.f32.mrb[3].mxu1 }
 0x1e5   :  { %v780_v48 = vpack.c.bf16 %v299_v41, %v298_v42  ;;  %v290_v49 = vadd.f32 %v289_v47, %v194_v45 }
 0x1e6   :  { %v301_v50 = vmax.f32 %v295_v46, 0.0 }
 0x1e7   :  { %v300_v51 = vmax.f32 %v290_v49, 0.0  ;;  %781 = vmatprep.subr.bf16.mxu0 %v780_v48 }
 0x1e8   :  { %783 = vmatpush3.bf16.msra.mxu0 %v780_v48 }
 0x1e9   :  { %v784_v52 = vpack.c.bf16 %v301_v50, %v300_v51 }
 0x1eb   :  { %785 = vmatprep.subr.bf16.mxu0 %v784_v52 }
 0x1ec   :  { %787 = vmatpush3.bf16.msra.mxu0 %v784_v52 }
 0x1ef   :  { %742 = vmatmul.mubr.msk.f32.vlgmr.msra.gmra.mrb[4].mxu0 %vm200_vm1, %v659_v53 }
 0x1f0   :  { %744 = vmatprep.mubr.msk.f32.mxu0 %vm200_vm1, %v660_v54 }
 0x1f3   :  { %745 = vmatmul.mubr.msk.f32.gmra.mrb[6].mxu0 %vm200_vm1, %v661_v55 }
 0x1f4   :  { %769 = vmatprep.mubr.msk.f32.mxu0 %vm200_vm1, %v546_v15 }
 0x2c2   :  { %v743_v61 = vpop.f32.mrb[4].mxu0 }
 0x2c3   :  { %v407_v62 = vadd.f32 %v743_v61, %v313_v60  ;;  %v401_v63 = vpop.f32.mrb[5].mxu0 }
 0x2c4   :  { %v402_v1 = vadd.f32 %v401_v63, %v309_v58 }
 0x2c5   :  { %v421_v2 = vmax.f32 %v407_v62, 0.0 }
 0x2c6   :  { %v420_v4 = vmax.f32 %v402_v1, 0.0  ;;  %v746_v7 = vpop.f32.mrb[6].mxu0 }
 0x2c7   :  { %v417_v5 = vadd.f32 %v746_v7, %v321_v3  ;;  %v411_v8 = vpop.f32.mrb[7].mxu0 }
 0x2c8   :  { %v788_v6 = vpack.c.bf16 %v421_v2, %v420_v4  ;;  %v412_v10 = vadd.f32 %v411_v8, %v317_v59 }
 0x2c9   :  { %v423_v9 = vmax.f32 %v417_v5, 0.0 }
 0x2ca   :  { %v422_v11 = vmax.f32 %v412_v10, 0.0  ;;  %789 = vmatprep.subr.bf16.mxu1 %v788_v6 }
 0x2cb   :  { %791 = vmatpush3.bf16.msra.mxu1 %v788_v6 }
 0x2cc   :  { %v792_v0 = vpack.c.bf16 %v423_v9, %v422_v11 }
 0x2ce   :  { %793 = vmatprep.subr.bf16.mxu1 %v792_v0 }
 0x2cf   :  { %795 = vmatpush3.bf16.msra.mxu1 %v792_v0 }
 0x2d2   :  { %756 = vmatmul.mubr.msk.f32.vlgmr.msra.gmra.mrb[4].mxu1 %vm200_vm1, %v667_v12 }
 0x2d3   :  { %758 = vmatprep.mubr.msk.f32.mxu1 %vm200_vm1, %v668_v13 }
 0x2d6   :  { %759 = vmatmul.mubr.msk.f32.gmra.mrb[6].mxu1 %vm200_vm1, %v669_v14 }
 0x3a5   :  { %v757_v20 = vpop.f32.mrb[4].mxu1 }
 0x3a6   :  { %v529_v21 = vadd.f32 %v757_v20, %v435_v19  ;;  %v523_v22 = vpop.f32.mrb[5].mxu1 }
 0x3a7   :  { %v524_v23 = vadd.f32 %v523_v22, %v431_v18 }
 0x3a8   :  { %v543_v24 = vmax.f32 %v529_v21, 0.0 }
 0x3a9   :  { %v542_v25 = vmax.f32 %v524_v23, 0.0  ;;  %v760_v27 = vpop.f32.mrb[6].mxu1 }
 0x3aa   :  { %v539_v29 = vadd.f32 %v760_v27, %v443_v26  ;;  %v533_v30 = vpop.f32.mrb[7].mxu1 }
 0x3ab   :  { %v796_v31 = vpack.c.bf16 %v543_v24, %v542_v25  ;;  %v534_v32 = vadd.f32 %v533_v30, %v439_v28 }
 0x3ac   :  { %v545_v33 = vmax.f32 %v539_v29, 0.0 }
 0x3ad   :  { %v544_v34 = vmax.f32 %v534_v32, 0.0  ;;  %797 = vmatprep.subr.bf16.mxu0 %v796_v31 }
 0x3ae   :  { %799 = vmatpush3.bf16.msra.mxu0 %v796_v31 }
 0x3af   :  { %v800_v35 = vpack.c.bf16 %v545_v33, %v544_v34 }
 0x3b1   :  { %801 = vmatprep.subr.bf16.mxu0 %v800_v35 }
 0x3b2   :  { %803 = vmatpush3.bf16.msra.mxu0 %v800_v35 }
 0x3b5   :  { %770 = vmatmul.mubr.msk.f32.vlgmr.msra.gmra.mrb[8].mxu0 %vm200_vm1, %v547_v36 }
 0x488   :  { %v771_v39 = vpop.f32.mrb[8].mxu0 }
 0x489   :  { %v632_v40 = vpop.f32.mrb[9].mxu0  ;;  %v638_v41 = vadd.f32 %v771_v39, %v558_v37 }
 0x48a   :  { %v633_v42 = vadd.f32 %v632_v40, %v553_v38 }
 0x48b   :  { %643 = vst.msk [vmem:[%s1069_s6 + $0x8] sm:$0xf] %vm642_vm2, %v638_v41 }
 0x48c   :  { %641 = vst.msk [vmem:[%s1069_s6] sm:$0xff] %vm78_vm0, %v633_v42 }
 0x48d   :  { %648 = vsyncpa [#allocation3], 1 }
 0x48e   :  { %649 = vsyncpa [#allocation5], 1 }

</bundles_post_ra>
